<compile_context>
chip_gen: v7x
topology: tpu7x:2x2x1
jax: 0.10.0
libtpu: 0.0.40
codegen_flags: <defaults>
</compile_context>

<pallas_src>
import functools

import jax
import jax.numpy as jnp
from jax import lax
from jax.experimental import pallas as pl
from jax.experimental.pallas import tpu as pltpu


# ---------------------------------------------------------------------------
# Kernel bodies
# ---------------------------------------------------------------------------
def _tile_logits_lse(a, ct, row0, *, inv_temp, subtract_max):
    """Shared per-tile work: scaled logits, diagonal predicate, log-sum-exp.

    a:    [TA, D] anchor rows (input dtype, bf16 or f32)
    ct:   [D, N]  contrast features, pre-transposed (input dtype)
    row0: scalar  global row index of this tile's first anchor
    """
    ta = a.shape[0]
    n = ct.shape[1]

    # Fold 1/temperature into the small [TA, D] operand (python-float weak type
    # keeps bf16 operands bf16 for the MXU; accumulation is f32).
    a = a * inv_temp
    logits = jnp.dot(a, ct, preferred_element_type=jnp.float32)           # [TA, N] MXU

    if subtract_max:
        # Matches the reference `logits - logits_max.detach()` stability shift
        # (mathematically a no-op for the loss, so it can be skipped when the
        # features are L2-normalized).
        logits = logits - jnp.max(logits, axis=1, keepdims=True)

    # Diagonal self-contrast predicate, offset by the tile's global row origin.
    row = row0 + lax.broadcasted_iota(jnp.int32, (ta, n), 0)
    col = lax.broadcasted_iota(jnp.int32, (ta, n), 1)
    diag = row == col

    # TODO(synk): optional bf16 exp (v6e/v7x EUP) is skipped to keep numerics.
    exp_logits = jnp.where(diag, 0.0, jnp.exp(logits))                    # EUP exp
    lse = jnp.log(jnp.sum(exp_logits, axis=1, keepdims=True))             # [TA, 1]
    return logits, diag, lse


def _emit_tile_sum(out_ref, loss_col):
    # Per-tile partial sum written as one aligned (8, 128) vreg: unmasked vector
    # store + tiny writeback DMA instead of a masked last-dim-1 column store.
    tile_sum = jnp.sum(loss_col, axis=0, keepdims=True)                   # (1, 1)
    out_ref[...] = jnp.broadcast_to(tile_sum, (8, 128))


def _supcon_kernel_codes(anchor_ref, ct_ref, acode_ref, ccode_ref,
                         w_lse_ref, w_pos_ref, out_ref, *,
                         inv_temp, tile_a, subtract_max):
    logits, diag, lse = _tile_logits_lse(
        anchor_ref[...], ct_ref[...], pl.program_id(0) * tile_a,
        inv_temp=inv_temp, subtract_max=subtract_max)
    # Boolean positive mask end-to-end (no f32 [TA, N] mask temporary).
    pos_b = jnp.logical_and(acode_ref[...] == ccode_ref[...],
                            jnp.logical_not(diag))
    pos_sum = jnp.sum(jnp.where(pos_b, logits, 0.0), axis=1, keepdims=True)
    # Per-anchor positive counts / loss scale are hoisted to the wrapper:
    #   loss_i = w_lse_i * lse_i - w_pos_i * pos_sum_i
    loss_col = w_lse_ref[...] * lse - w_pos_ref[...] * pos_sum            # [TA, 1]
    _emit_tile_sum(out_ref, loss_col)


def _supcon_kernel_mask(anchor_ref, ct_ref, mask_ref,
                        w_lse_ref, w_pos_ref, out_ref, *,
                        inv_temp, tile_a, subtract_max):
    logits, diag, lse = _tile_logits_lse(
        anchor_ref[...], ct_ref[...], pl.program_id(0) * tile_a,
        inv_temp=inv_temp, subtract_max=subtract_max)
    m = jnp.where(diag, 0.0, mask_ref[...].astype(jnp.float32))
    pos_sum = jnp.sum(m * logits, axis=1, keepdims=True)
    loss_col = w_lse_ref[...] * lse - w_pos_ref[...] * pos_sum
    _emit_tile_sum(out_ref, loss_col)


# ---------------------------------------------------------------------------
# Wrapper
# ---------------------------------------------------------------------------
def _vmem_capacity_bytes():
    try:
        return int(pltpu.get_tpu_info().vmem_capacity_bytes)
    except Exception:
        return 64 * 1024 * 1024            # conservative: v7x per-TC VMEM


def _pick_tile_a(A, N, D, in_bytes, *, has_mask, vmem_bytes):
    """Anchor-tile size from a generation-aware VMEM budget."""
    budget = int(vmem_bytes) * 3 // 4                  # ~96 MiB v5e/v6e, ~48 MiB v7x
    resident = 2 * D * N * in_bytes + 2 * 4 * N        # contrast^T + ccode (double-buffered)
    per_row = 4 * N * 4                                # ~4 f32 [TA, N] temporaries in flight
    per_row += 2 * D * in_bytes                        # anchor tile (double-buffered)
    if has_mask:
        per_row += 2 * N * 4                           # explicit tiled-mask stream
    per_row += 8 * 4                                   # codes / weights / loss rows
    sub = 16 if in_bytes < 4 else 8                    # bf16 sublane packing
    avail = max(budget - resident, sub * per_row)
    ta = int(avail // per_row)
    # Prefer MXU-friendly multiples (2x256x256 MXU on v6e/v7x, 128 lanes on v5e).
    for align in (256, 128, sub):
        if ta >= align:
            ta = (ta // align) * align
            break
    ta = max(sub, min(1024, ta))
    a_pad_min = -(-A // sub) * sub
    return min(ta, a_pad_min), sub


def supcon_loss(features, labels=None, mask=None, *,
                temperature=0.07, contrast_mode='all', base_temperature=0.07,
                tile_a=None, compute_dtype=None, assume_normalized=False):
    """Pallas implementation of SupConLoss.forward. Returns a scalar f32.

    compute_dtype:     optionally cast features (e.g. to bf16) for the MXU —
                       halves the resident [D, N] VMEM footprint at a small
                       rounding cost vs the f32 reference.
    assume_normalized: skip the (mathematically redundant) row-max shift; safe
                       when features are L2-normalized (|logit| <= 1/temp).
    """
    if features.ndim < 3:
        raise ValueError('`features` needs to be [bsz, n_views, ...], '
                         'at least 3 dimensions are required')
    bsz, n_views = features.shape[0], features.shape[1]
    feats = features.reshape(bsz, n_views, -1)
    if compute_dtype is not None:
        feats = feats.astype(compute_dtype)
    D = feats.shape[-1]
    N = n_views * bsz

    if labels is not None and mask is not None:
        raise ValueError('Cannot define both `labels` and `mask`')

    # contrast_feature = cat(unbind(features, dim=1), dim=0): row = view*bsz + b
    contrast_feature = jnp.transpose(feats, (1, 0, 2)).reshape(N, D)
    if contrast_mode == 'all':
        anchor_feature, anchor_count = contrast_feature, n_views
    elif contrast_mode == 'one':
        anchor_feature, anchor_count = feats[:, 0], 1
    else:
        raise ValueError('Unknown mode: {}'.format(contrast_mode))
    A = anchor_count * bsz

    # Pre-transpose once so the kernel does a plain [TA, D] x [D, N] matmul
    # with lane-dense N and no in-kernel XLU transpose.
    contrast_t = contrast_feature.T                                        # [D, N]

    in_bytes = jnp.dtype(feats.dtype).itemsize
    vmem_bytes = _vmem_capacity_bytes()
    if tile_a is not None:
        ta = int(tile_a)
    else:
        ta, _ = _pick_tile_a(A, N, D, in_bytes, has_mask=(mask is not None),
                             vmem_bytes=vmem_bytes)
    num_tiles = -(-A // ta)
    if tile_a is None and num_tiles < 2 and A >= 512:
        # v7x megacore: a single giant tile would idle one TensorCore.
        half = -(-A // 2)
        ta = -(-half // 128) * 128
        num_tiles = -(-A // ta)
    a_pad = num_tiles * ta
    pad_rows = a_pad - A

    inv_temp = 1.0 / float(temperature)
    loss_scale = float(temperature) / float(base_temperature)

    compiler_params = pltpu.CompilerParams(
        dimension_semantics=("parallel",),             # shard A-tiles across TCs
        vmem_limit_bytes=int(vmem_bytes) * 7 // 8,     # ~112 MiB v5e/v6e, ~56 MiB v7x
    )
    out_shape = jax.ShapeDtypeStruct((num_tiles * 8, 128), jnp.float32)
    out_spec = pl.BlockSpec((8, 128), lambda i: (i, 0))
    anchor_spec = pl.BlockSpec((ta, D), lambda i: (i, 0))
    ct_spec = pl.BlockSpec((D, N), lambda i: (0, 0))   # constant block -> resident
    col_spec = pl.BlockSpec((ta, 1), lambda i: (i, 0))

    if pad_rows:
        anchor_feature = jnp.pad(anchor_feature, ((0, pad_rows), (0, 0)))

    # Per-anchor loss weights hoisted out of the kernel:
    #   loss_i = w_lse_i * lse_i - w_pos_i * sum_j(mask_ij * logit_ij)
    # w_lse = T/T_base, w_pos = (T/T_base)/num_positives_i; padded rows get
    # zero weights so they contribute exactly nothing to the per-tile sums.
    def _per_anchor_weights(pos_cnt_base):
        wp = jnp.tile(loss_scale / pos_cnt_base.astype(jnp.float32), anchor_count)
        wl = jnp.full((A,), loss_scale, dtype=jnp.float32)
        if pad_rows:
            wp = jnp.pad(wp, (0, pad_rows))
            wl = jnp.pad(wl, (0, pad_rows))
        return wl.reshape(a_pad, 1), wp.reshape(a_pad, 1)

    if mask is None:
        # Positives rebuilt in-kernel from per-row codes (labels / sample ids):
        # no tiled [A, N] mask ever hits HBM or VMEM.
        if labels is None:
            codes = jnp.arange(bsz, dtype=jnp.int32)            # SimCLR: sample id
        else:
            labels = jnp.asarray(labels).reshape(-1)
            if labels.shape[0] != bsz:
                raise ValueError('Num of labels does not match num of features')
            if jnp.issubdtype(labels.dtype, jnp.integer):
                codes = labels.astype(jnp.int32)                # exact int compare
            else:
                codes = labels.astype(jnp.float32)
        pos_cnt_base = (n_views *
                        jnp.sum(codes[:, None] == codes[None, :], axis=1)
                        .astype(jnp.float32)) - 1.0
        w_lse, w_pos = _per_anchor_weights(pos_cnt_base)

        ccode = jnp.tile(codes, n_views).reshape(1, N)          # contrast col code
        acode = jnp.tile(codes, anchor_count).reshape(A, 1)     # anchor row code
        if pad_rows:
            sentinel = (jnp.iinfo(jnp.int32).min if codes.dtype == jnp.int32
                        else jnp.nan)
            acode = jnp.pad(acode, ((0, pad_rows), (0, 0)),
                            constant_values=sentinel)
        kernel = functools.partial(_supcon_kernel_codes, inv_temp=inv_temp,
                                   tile_a=ta,
                                   subtract_max=not assume_normalized)
        grid_spec = pltpu.PrefetchScalarGridSpec(
            num_scalar_prefetch=0, grid=(num_tiles,),
            in_specs=[anchor_spec, ct_spec, col_spec,
                      pl.BlockSpec((1, N), lambda i: (0, 0)),
                      col_spec, col_spec],
            out_specs=out_spec)
        per_tile = pl.pallas_call(
            kernel, out_shape=out_shape, grid_spec=grid_spec,
            compiler_params=compiler_params,
        )(anchor_feature, contrast_t, acode, ccode, w_lse, w_pos)
    else:
        # TODO(synk): the explicit user-mask path still streams an f32,
        # n_views-tiled [A, N] mask from HBM; int8 / untiled variants are
        # skipped to preserve arbitrary float-valued mask semantics.
        base_mask = jnp.asarray(mask, dtype=jnp.float32)
        pos_cnt_base = n_views * jnp.sum(base_mask, axis=1) - jnp.diagonal(base_mask)
        w_lse, w_pos = _per_anchor_weights(pos_cnt_base)

        tiled_mask = jnp.tile(base_mask, (anchor_count, n_views))
        if pad_rows:
            tiled_mask = jnp.pad(tiled_mask, ((0, pad_rows), (0, 0)))
        kernel = functools.partial(_supcon_kernel_mask, inv_temp=inv_temp,
                                   tile_a=ta,
                                   subtract_max=not assume_normalized)
        grid_spec = pltpu.PrefetchScalarGridSpec(
            num_scalar_prefetch=0, grid=(num_tiles,),
            in_specs=[anchor_spec, ct_spec,
                      pl.BlockSpec((ta, N), lambda i: (i, 0)),
                      col_spec, col_spec],
            out_specs=out_spec)
        per_tile = pl.pallas_call(
            kernel, out_shape=out_shape, grid_spec=grid_spec,
            compiler_params=compiler_params,
        )(anchor_feature, contrast_t, tiled_mask, w_lse, w_pos)

    # loss.view(anchor_count, batch_size).mean() == (sum over all A anchors)/A.
    tile_sums = per_tile.reshape(num_tiles, 8, 128)[:, 0, 0]
    return jnp.sum(tile_sums) / A


# ---------------------------------------------------------------------------
# Pure-JAX reference (mirrors the PyTorch forward) for validation
# ---------------------------------------------------------------------------
def _supcon_loss_ref(features, labels=None, mask=None, *,
                     temperature=0.07, contrast_mode='all', base_temperature=0.07):
    bsz, n_views = features.shape[0], features.shape[1]
    feats = features.reshape(bsz, n_views, -1).astype(jnp.float32)
    if labels is None and mask is None:
        base_mask = jnp.eye(bsz, dtype=jnp.float32)
    elif labels is not None:
        labels = labels.reshape(-1, 1)
        base_mask = (labels == labels.T).astype(jnp.float32)
    else:
        base_mask = mask.astype(jnp.float32)
    contrast_feature = jnp.transpose(feats, (1, 0, 2)).reshape(n_views * bsz, -1)
    if contrast_mode == 'all':
        anchor_feature, anchor_count = contrast_feature, n_views
    else:
        anchor_feature, anchor_count = feats[:, 0], 1
    adc = jnp.dot(anchor_feature, contrast_feature.T) / temperature
    logits = adc - jnp.max(adc, axis=1, keepdims=True)
    m = jnp.tile(base_mask, (anchor_count, n_views))
    A = anchor_count * bsz
    logits_mask = 1.0 - jnp.eye(A, n_views * bsz, dtype=jnp.float32)
    m = m * logits_mask
    exp_logits = jnp.exp(logits) * logits_mask
    log_prob = logits - jnp.log(jnp.sum(exp_logits, axis=1, keepdims=True))
    mean_log_prob_pos = jnp.sum(m * log_prob, axis=1) / jnp.sum(m, axis=1)
    loss = -(temperature / base_temperature) * mean_log_prob_pos
    return jnp.mean(loss)


if __name__ == "__main__":
    key = jax.random.PRNGKey(0)
    kf, kl = jax.random.split(key)

    bsz, n_views, dim = 8, 2, 32
    features = jax.random.normal(kf, (bsz, n_views, dim), dtype=jnp.float32)
    features = features / jnp.linalg.norm(features, axis=-1, keepdims=True)
    labels = jax.random.randint(kl, (bsz,), 0, 4)

    def check(got, want, name):
        got = jax.block_until_ready(got)
        assert jnp.allclose(got, want, atol=1e-3, rtol=1e-3), (name, got, want)

    # Supervised ('all' mode, labels given).
    check(supcon_loss(features, labels=labels),
          _supcon_loss_ref(features, labels=labels), "supervised")

    # Multi-tile grid (tile_a=8 -> 2 anchor tiles: exercises per-tile partial
    # sums and the diagonal offset under tiling).
    check(supcon_loss(features, labels=labels, tile_a=8),
          _supcon_loss_ref(features, labels=labels), "multi-tile")

    # Unsupervised SimCLR (labels=None, mask=None -> eye mask).
    check(supcon_loss(features), _supcon_loss_ref(features), "simclr")

    # Explicit mask path (falls back to the tiled-mask kernel).
    mask_demo = (labels.reshape(-1, 1) == labels.reshape(1, -1)).astype(jnp.float32)
    check(supcon_loss(features, mask=mask_demo),
          _supcon_loss_ref(features, mask=mask_demo), "mask")

    # contrast_mode='one'.
    check(supcon_loss(features, labels=labels, contrast_mode='one'),
          _supcon_loss_ref(features, labels=labels, contrast_mode='one'), "one")

    # Non-multiple-of-8 batch exercises anchor-row padding + zeroed pad weights.
    check(supcon_loss(features[:6], labels=labels[:6]),
          _supcon_loss_ref(features[:6], labels=labels[:6]), "padded")

    # assume_normalized=True drops the (mathematically redundant) row-max shift.
    check(supcon_loss(features, labels=labels, assume_normalized=True),
          _supcon_loss_ref(features, labels=labels), "no-max-shift")

    # bf16 MXU paths (sanity only: bf16 rounding is intentionally not f32-exact).
    loss_bf16_in = supcon_loss(features.astype(jnp.bfloat16), labels=labels)
    jax.block_until_ready(loss_bf16_in)
    assert bool(jnp.isfinite(loss_bf16_in)), loss_bf16_in
    loss_bf16_cast = supcon_loss(features, labels=labels,
                                 compute_dtype=jnp.bfloat16)
    jax.block_until_ready(loss_bf16_cast)
    assert bool(jnp.isfinite(loss_bf16_cast)), loss_bf16_cast

    print("KERNEL_OK")
</pallas_src>

<mosaic_0001>
module attributes {stable_mosaic.version = 11 : i64} {
  func.func @_supcon_kernel_codes(%arg0: i32, %arg1: memref<16x32xf32, #tpu.memory_space<vmem>>, %arg2: memref<32x16xf32, #tpu.memory_space<vmem>>, %arg3: memref<16x1xi32, #tpu.memory_space<vmem>>, %arg4: memref<1x16xi32, #tpu.memory_space<vmem>>, %arg5: memref<16x1xf32, #tpu.memory_space<vmem>>, %arg6: memref<16x1xf32, #tpu.memory_space<vmem>>, %arg7: memref<8x128xf32, #tpu.memory_space<vmem>>) attributes {dimension_semantics = [#tpu.dimension_semantics<parallel>], iteration_bounds = array<i64: 1>, scalar_prefetch = 0 : i64, scratch_operands = 0 : i64, tpu.core_type = #tpu.core_type<tc>, window_params = [{transform_indices = @transform_0, window_bounds = array<i64: 16, 32>}, {pipeline_mode = #tpu.pipeline_mode<synchronous>, transform_indices = @transform_1, window_bounds = array<i64: 32, 16>}, {transform_indices = @transform_2, window_bounds = array<i64: 16, 1>}, {pipeline_mode = #tpu.pipeline_mode<synchronous>, transform_indices = @transform_3, window_bounds = array<i64: 1, 16>}, {transform_indices = @transform_4, window_bounds = array<i64: 16, 1>}, {transform_indices = @transform_5, window_bounds = array<i64: 16, 1>}, {transform_indices = @transform_6, window_bounds = array<i64: 8, 128>}]} {
    %c0 = arith.constant 0 : index
    %c0_0 = arith.constant 0 : index
    %0 = vector.load %arg1[%c0, %c0_0] : memref<16x32xf32, #tpu.memory_space<vmem>>, vector<16x32xf32>
    %c0_1 = arith.constant 0 : index
    %c0_2 = arith.constant 0 : index
    %1 = vector.load %arg2[%c0_1, %c0_2] : memref<32x16xf32, #tpu.memory_space<vmem>>, vector<32x16xf32>
    %c16_i32 = arith.constant 16 : i32
    %2 = arith.muli %arg0, %c16_i32 : i32
    %cst = arith.constant 14.2857141 : f32
    %3 = vector.broadcast %cst : f32 to vector<16x32xf32>
    %4 = arith.mulf %0, %3 : vector<16x32xf32>
    %cst_3 = arith.constant dense<0.000000e+00> : vector<16x16xf32>
    %5 = tpu.matmul %4, %1, %cst_3 {dimension_numbers = #tpu.dot_dimension_numbers<[1], [0], [0], [1], [0, 0, 1, 1], [], []>} : vector<16x32xf32>, vector<32x16xf32>, vector<16x16xf32> -> vector<16x16xf32>
    %cst_4 = arith.constant dense<0xFF800000> : vector<16xf32>
    %6 = vector.multi_reduction <maximumf>, %5, %cst_4 [1] : vector<16x16xf32> to vector<16xf32>
    %7 = vector.shape_cast %6 : vector<16xf32> to vector<16x1xf32>
    %8 = vector.broadcast %7 : vector<16x1xf32> to vector<16x16xf32>
    %9 = arith.subf %5, %8 : vector<16x16xf32>
    %10 = tpu.iota {dimensions = array<i32: 0>} : vector<16x16xi32>
    %11 = vector.broadcast %2 : i32 to vector<16x16xi32>
    %12 = arith.addi %11, %10 : vector<16x16xi32>
    %13 = tpu.iota {dimensions = array<i32: 1>} : vector<16x16xi32>
    %14 = arith.cmpi eq, %12, %13 : vector<16x16xi32>
    %15 = math.exp %9 : vector<16x16xf32>
    %cst_5 = arith.constant 0.000000e+00 : f32
    %16 = vector.broadcast %cst_5 : f32 to vector<16x16xf32>
    %17 = arith.select %14, %16, %15 : vector<16x16xi1>, vector<16x16xf32>
    %cst_6 = arith.constant dense<0.000000e+00> : vector<16xf32>
    %18 = vector.multi_reduction <add>, %17, %cst_6 [1] : vector<16x16xf32> to vector<16xf32>
    %19 = vector.shape_cast %18 : vector<16xf32> to vector<16x1xf32>
    %20 = math.log %19 : vector<16x1xf32>
    %c0_7 = arith.constant 0 : index
    %c0_8 = arith.constant 0 : index
    %21 = vector.load %arg3[%c0_7, %c0_8] : memref<16x1xi32, #tpu.memory_space<vmem>>, vector<16x1xi32>
    %c0_9 = arith.constant 0 : index
    %c0_10 = arith.constant 0 : index
    %22 = vector.load %arg4[%c0_9, %c0_10] : memref<1x16xi32, #tpu.memory_space<vmem>>, vector<1x16xi32>
    %23 = vector.broadcast %21 : vector<16x1xi32> to vector<16x16xi32>
    %24 = vector.broadcast %22 : vector<1x16xi32> to vector<16x16xi32>
    %25 = arith.cmpi eq, %23, %24 : vector<16x16xi32>
    %cst_11 = arith.constant dense<true> : vector<16x16xi1>
    %26 = arith.xori %14, %cst_11 : vector<16x16xi1>
    %27 = arith.andi %25, %26 : vector<16x16xi1>
    %cst_12 = arith.constant 0.000000e+00 : f32
    %28 = vector.broadcast %cst_12 : f32 to vector<16x16xf32>
    %29 = arith.select %27, %9, %28 : vector<16x16xi1>, vector<16x16xf32>
    %cst_13 = arith.constant dense<0.000000e+00> : vector<16xf32>
    %30 = vector.multi_reduction <add>, %29, %cst_13 [1] : vector<16x16xf32> to vector<16xf32>
    %31 = vector.shape_cast %30 : vector<16xf32> to vector<16x1xf32>
    %c0_14 = arith.constant 0 : index
    %c0_15 = arith.constant 0 : index
    %32 = vector.load %arg5[%c0_14, %c0_15] : memref<16x1xf32, #tpu.memory_space<vmem>>, vector<16x1xf32>
    %33 = arith.mulf %32, %20 : vector<16x1xf32>
    %c0_16 = arith.constant 0 : index
    %c0_17 = arith.constant 0 : index
    %34 = vector.load %arg6[%c0_16, %c0_17] : memref<16x1xf32, #tpu.memory_space<vmem>>, vector<16x1xf32>
    %35 = arith.mulf %34, %31 : vector<16x1xf32>
    %36 = arith.subf %33, %35 : vector<16x1xf32>
    %cst_18 = arith.constant dense<0.000000e+00> : vector<1xf32>
    %37 = vector.multi_reduction <add>, %36, %cst_18 [0] : vector<16x1xf32> to vector<1xf32>
    %38 = vector.shape_cast %37 : vector<1xf32> to vector<1x1xf32>
    %39 = vector.shape_cast %38 : vector<1x1xf32> to vector<1x1xf32>
    %40 = vector.broadcast %39 : vector<1x1xf32> to vector<8x128xf32>
    %c0_19 = arith.constant 0 : index
    %c0_20 = arith.constant 0 : index
    %41 = vector.load %arg7[%c0_19, %c0_20] : memref<8x128xf32, #tpu.memory_space<vmem>>, vector<8x128xf32>
    tpu.vector_store %arg7[%c0_19, %c0_20], %40 {strides = array<i32>} : memref<8x128xf32, #tpu.memory_space<vmem>>, vector<8x128xf32>,
    return
  }
  func.func @transform_0(%arg0: i32) -> (i32, i32) {
    %c0_i32 = arith.constant 0 : i32
    %c0_i32_0 = arith.constant 0 : i32
    return %arg0, %c0_i32 : i32, i32
  }
  func.func @transform_1(%arg0: i32) -> (i32, i32) {
    %c0_i32 = arith.constant 0 : i32
    %c0_i32_0 = arith.constant 0 : i32
    %c0_i32_1 = arith.constant 0 : i32
    return %c0_i32, %c0_i32_0 : i32, i32
  }
  func.func @transform_2(%arg0: i32) -> (i32, i32) {
    %c0_i32 = arith.constant 0 : i32
    %c0_i32_0 = arith.constant 0 : i32
    return %arg0, %c0_i32 : i32, i32
  }
  func.func @transform_3(%arg0: i32) -> (i32, i32) {
    %c0_i32 = arith.constant 0 : i32
    %c0_i32_0 = arith.constant 0 : i32
    %c0_i32_1 = arith.constant 0 : i32
    return %c0_i32, %c0_i32_0 : i32, i32
  }
  func.func @transform_4(%arg0: i32) -> (i32, i32) {
    %c0_i32 = arith.constant 0 : i32
    %c0_i32_0 = arith.constant 0 : i32
    return %arg0, %c0_i32 : i32, i32
  }
  func.func @transform_5(%arg0: i32) -> (i32, i32) {
    %c0_i32 = arith.constant 0 : i32
    %c0_i32_0 = arith.constant 0 : i32
    return %arg0, %c0_i32 : i32, i32
  }
  func.func @transform_6(%arg0: i32) -> (i32, i32) {
    %c0_i32 = arith.constant 0 : i32
    %c0_i32_0 = arith.constant 0 : i32
    return %arg0, %c0_i32 : i32, i32
  }
}

</mosaic_0001>

<bundles_post_ra>
// kernel: tpu_custom_call.1
= control target key start
LH: loop header
LB: loop body
LE: loop exit
PB: predicated region body
PF: predicated region fallthrough
CT: control target
= control target key end

     0   :  { %vm33_vm0 = vcmask 261120   ;;  %s377_s0 = inlined_call_operand.vmem [shape: f32[16,32], index: 0, kind: input, shape index: {}]   ;;  %s378_s1 = inlined_call_operand.vmem [shape: f32[32,16], index: 1, kind: input, shape index: {}]   ;;  %s379_s2 = inlined_call_operand.vmem [shape: s32[16,1], index: 2, kind: input, shape index: {}]   ;;  %s380_s3 = inlined_call_operand.vmem [shape: s32[1,16], index: 3, kind: input, shape index: {}]   ;;  %s381_s4 = inlined_call_operand.vmem [shape: f32[16,1], index: 4, kind: input, shape index: {}]   ;;  %s382_s5 = inlined_call_operand.vmem [shape: f32[16,1], index: 5, kind: input, shape index: {}]   ;;  %s383_s6 = inlined_call_operand.hbm [shape: f32[8,128], index: 6, kind: output, shape index: {}]  }
   0x1   :  { %v26_v0 = vld [vmem:[%s378_s1] sm:$0xff]  ;;  %v27_v1 = vld [vmem:[%s378_s1 + $0x8] sm:$0xff]  ;;  %v28_v2 = vld [vmem:[%s378_s1 + $0x10] sm:$0xff] }
   0x2   :  { %v237_v3 = vpack.c.bf16 %v27_v1, %v26_v0  ;;  %v29_v4 = vld [vmem:[%s378_s1 + $0x18] sm:$0xff]  ;;  %v24_v5 = vld [vmem:[%s377_s0] sm:$0xff] }
   0x3   :  { %v241_v6 = vpack.c.bf16 %v29_v4, %v28_v2  ;;  %v31_v7 = vmul.f32 14.285714, %v24_v5 }
   0x4   :  { %11 = vsyncpa [#allocation3], 0  ;;  %238 = vmatprep.subr.bf16.mxu0 %v237_v3  ;;  %v25_v8 = vld [vmem:[%s377_s0 + $0x8] sm:$0xff]  ;;  %v150_v10 = vld [vmem:[%s379_s2] sm:$0xff]  ;;  %v282_v11 = vmov 0   ;;  %vm115_vm1 = vcmask 130048   ;;  %v124_v18 = vlaneseq }
   0x5   :  { %240 = vmatpush3.bf16.msra.mxu0 %v237_v3  ;;  %234 = vmatprep.mubr.msk.f32.mxu0 %vm33_vm0, %v31_v7  ;;  %v32_v9 = vmul.f32 14.285714, %v25_v8  ;;  %v151_v12 = vld [vmem:[%s379_s2 + $0x8] sm:$0xff]  ;;  %v219_v27 = vld [vmem:[%s380_s3] ss:$0 sm:$0xff]  ;;  %vm283_vm4 = vmmov 1  }
   0x6   :  { %242 = vmatprep.subr.bf16.mxu0 %v241_v6  ;;  %248 = vset.pattern.permute.xlu1 %v282_v11  ;;  %v125_v22 = vshrl.u32 %v124_v18, 7  ;;  %v131_v23 = vand.u32 127, %v124_v18  ;;  %v177_v44 = vld [vmem:[%s381_s4] sm:$0xff]  ;;  %v178_v49 = vld [vmem:[%s381_s4 + $0x8] sm:$0xff]  ;;  %vm187_vm11 = vcmask 7168   ;;  %s284_s4 = smov [#allocation2]  }
   0x7   :  { %249 = vset.pattern.permute.xlu0 %v282_v11  ;;  %154 = vperm.xlu1 %248, %v150_v10   ;;  %v181_v46 = vld [vmem:[%s382_s5] sm:$0xff]  ;;  %v182_v50 = vld [vmem:[%s382_s5 + $0x8] sm:$0xff]  ;;  %s209_s5 = sshll.u32 %s284_s4, 4  ;;  %s210_s5 = int_to_ptr.vmem [resolvable:$true] %s209_s5 }
   0x8   :  { %vm132_vm2 = vcmp.eq.s32.totalorder %v125_v22, %v131_v23  ;;  %v126_v28 = vadd.s32 8, %v125_v22  ;;  %s258_s19 = scalar_lea.vmem %s210_s5, 128  ;;  %p263_p1 = scmp.lt.s32.totalorder %s210_s5, %s210_s5 }
   0x9   :  { %244 = vmatpush3.bf16.msra.mxu0 %v241_v6  ;;  %vm165_vm5 = vmxor %vm132_vm2, %vm283_vm4  ;;  %p259_p0 = scmp.ne.s32.totalorder %s210_s5, %s258_s19  ;;  %p264_p2 = scmp.lt.s32.totalorder %s258_s19, %s258_s19 }
   0xa   :  { %vm133_vm6 = vcmp.eq.s32.totalorder %v126_v28, %v131_v23 }
   0xb   :  { %157 = vperm.xlu1 %248, %v151_v12   ;;  %vm166_vm9 = vmxor %vm133_vm6, %vm283_vm4  ;;  %p265_p3 = por %p264_p2, %p263_p1 }
   0xc   :  { %235 = vmatmul.mubr.msk.f32.vlgmr.msra.gmra.mrb[0].mxu0 %vm33_vm0, %v32_v9 }
   0xd   :  { %p266_p4 = pnand %p265_p3, %p259_p0 }
  0x86   :  { %v155_v25 = vpop.permute.xlu1 %154 }
  0x87   :  { %vm163_vm3 = vcmp.eq.s32.totalorder %v155_v25, %v219_v27 }
  0x88   :  { %vm167_vm7 = vmand %vm163_vm3, %vm165_vm5 }
  0x8a   :  { %v158_v29 = vpop.permute.xlu1 %157 }
  0x8b   :  { %vm164_vm8 = vcmp.eq.s32.totalorder %v158_v29, %v219_v27 }
  0x8c   :  { %vm168_vm10 = vmand %vm164_vm8, %vm166_vm9 }
  0xdf   :  { %v236_v13 = vpop.f32.mrb[0].mxu0 }
  0xe0   :  { %v106_v14 = vpop.f32.mrb[1].mxu0  ;;  %v119_v16 = vsel %vm115_vm1, %v236_v13, -inf }
  0xe1   :  { %v116_v15 = vsel %vm115_vm1, %v106_v14, -inf }
  0xe2   :  { %117 = vmax.xlane.f32.xlu0 %v116_v15 }
  0xe6   :  { %120 = vmax.xlane.f32.xlu0 %v119_v16 }
 0x16f   :  { %v118_v17 = vpop.xlane.xlu0 %117 }
 0x170   :  { %v122_v19 = vsub.f32 %v106_v14, %v118_v17 }
 0x172   :  { %v134_v20 = vmul.f32 1.442695, %v122_v19  ;;  %v169_v33 = vsel %vm167_vm7, %v122_v19, 0.0 }
 0x173   :  { %v121_v21 = vpop.xlane.xlu0 %120  ;;  %v171_v36 = vsel %vm115_vm1, %v169_v33, 0.0 }
 0x174   :  { %250 = vpow2.f32 %v134_v20  ;;  %v123_v24 = vsub.f32 %v236_v13, %v121_v21 }
 0x176   :  { %v136_v26 = vmul.f32 1.442695, %v123_v24  ;;  %v170_v38 = vsel %vm168_vm10, %v123_v24, 0.0 }
 0x177   :  { %v174_v39 = vsel %vm115_vm1, %v170_v38, 0.0 }
 0x178   :  { %252 = vpow2.f32 %v136_v26 }
 0x17e   :  { %v251_v30 = vpop.eup %250 }
 0x17f   :  { %v138_v31 = vsel %vm132_vm2, 0.0, %v251_v30 }
 0x180   :  { %v140_v32 = vsel %vm115_vm1, %v138_v31, 0.0 }
 0x181   :  { %141 = vadd.xlane.f32.xlu0 %v140_v32 }
 0x182   :  { %v253_v34 = vpop.eup %252 }
 0x183   :  { %v139_v35 = vsel %vm133_vm6, 0.0, %v253_v34 }
 0x184   :  { %v143_v37 = vsel %vm115_vm1, %v139_v35, 0.0 }
 0x185   :  { %172 = vadd.xlane.f32.xlu0 %v171_v36  ;;  %144 = vadd.xlane.f32.xlu1 %v143_v37 }
 0x189   :  { %175 = vadd.xlane.f32.xlu0 %v174_v39 }
 0x20e   :  { %v142_v40 = vpop.xlane.xlu0 %141 }
 0x20f   :  { %254 = vlog2.f32 %v142_v40 }
 0x212   :  { %v145_v41 = vpop.xlane.xlu1 %144  ;;  %v173_v42 = vpop.xlane.xlu0 %172 }
 0x213   :  { %256 = vlog2.f32 %v145_v41  ;;  %v183_v53 = vmul.f32 %v181_v46, %v173_v42 }
 0x216   :  { %v176_v51 = vpop.xlane.xlu0 %175 }
 0x217   :  { %v184_v56 = vmul.f32 %v182_v50, %v176_v51 }
 0x219   :  { %v255_v43 = vpop.eup %254 }
 0x21a   :  { %v147_v45 = vmul.f32 0.6931472, %v255_v43 }
 0x21c   :  { %v179_v47 = vmul.f32 %v177_v44, %v147_v45 }
 0x21d   :  { %v257_v48 = vpop.eup %256 }
 0x21e   :  { %v149_v52 = vmul.f32 0.6931472, %v257_v48  ;;  %v185_v54 = vsub.f32 %v179_v47, %v183_v53 }
 0x220   :  { %v180_v55 = vmul.f32 %v178_v49, %v149_v52  ;;  %v188_v58 = vsel %vm187_vm11, %v185_v54, 0.0 }
 0x222   :  { %v186_v57 = vsub.f32 %v180_v55, %v184_v56 }
 0x224   :  { %v189_v59 = vsel %vm187_vm11, %v186_v57, 0.0 }
 0x225   :  { %v190_v60 = vadd.f32 %v189_v59, %v188_v58 }
 0x227   :  { %v191_v61 = vrot.slane %v190_v60, 4 }
 0x229   :  { %v192_v62 = vadd.f32 %v191_v61, %v190_v60 }
 0x22b   :  { %v193_v63 = vrot.slane %v192_v62, 2 }
 0x22d   :  { %v194_v0 = vadd.f32 %v193_v63, %v192_v62 }
 0x22f   :  { %v195_v1 = vrot.slane %v194_v0, 1 }
 0x231   :  { %v196_v2 = vadd.f32 %v195_v1, %v194_v0 }
 0x233   :  { %199 = vperm.xlu0 %249, %v196_v2  }
 0x2b2   :  { %v200_v3 = vpop.permute.xlu0 %199 }
 0x2b3   :  { %202 = vst [vmem:[#allocation2] sm:$0xff] %v200_v3 }
 0x2b4   :  { %269 = shalt.err (!%p266_p4)
}
 0x2b5   :  { %s270_s22 = scalar_lea.hbm %s383_s6, 128 }
 0x2b6   :  { %p271_p5 = scmp.ne.s32.totalorder %s383_s6, %s270_s22  ;;  %p274_p6 = scmp.lt.u32.totalorder %s270_s22, %s383_s6 }
 0x2b8   :  { %p276_p7 = pnand %p274_p6, %p271_p5 }
 0x2ba   :  { %279 = shalt.err (!%p276_p7)
}
 0x2bb   :  { %212 = dma.vmem_to_hbm [thread:$0]  %s210_s5, 128, %s383_s6, [#allocation3]  }
 0x2bc   :  { %280 = dma.done.wait [#allocation3], 128  }
 0x2bd   :  { %281 = vsyncadd [#allocation3], 4294967168 }
 0x2be   :  { %216 = vsyncpa [#allocation3], 1 }

</bundles_post_ra>
